<compile_context>
chip_gen: v7x
topology: tpu7x:2x2x1
jax: 0.10.0
libtpu: 0.0.40
codegen_flags: <defaults>
</compile_context>

<pallas_src>
import functools
import math

import jax
import jax.numpy as jnp
from jax.experimental import pallas as pl
from jax.experimental.pallas import tpu as pltpu


# ---------------------------------------------------------------------------
# Hardware-aware sizing helpers
# ---------------------------------------------------------------------------

def _cdiv(a, b):
    return -(-a // b)


def _round_up(a, b):
    return _cdiv(a, b) * b


@functools.lru_cache(maxsize=None)
def _vmem_capacity_bytes():
    """Physical VMEM per TensorCore; conservative fallback if query fails."""
    try:
        info = pltpu.get_tpu_info()
        cap = int(getattr(info, "vmem_capacity_bytes"))
        if cap > 0:
            return cap
    except Exception:
        pass
    return 64 << 20          # v7x-sized conservative default


def _vmem_limit_bytes():
    """Scoped-VMEM limit: above the 16/32 MiB defaults, headroom kept.

    v5e/v6e (128 MiB physical) -> 96 MiB; v7x (64 MiB physical) -> 48 MiB."""
    cap = _vmem_capacity_bytes()
    return max(32 << 20, min(cap - (16 << 20), 96 << 20))


def _block_f32_budget():
    """f32 bytes for ONE block.  in+out blocks x double-buffering plus the
    in-kernel f32 working copy must all fit, so stay well under capacity."""
    return max(256 << 10, min(4 << 20, _vmem_capacity_bytes() // 16))


# ---------------------------------------------------------------------------
# Kernels
# ---------------------------------------------------------------------------

def _pow_sum(x_f32, axis, power):
    if power == 2:
        return jnp.sum(x_f32 * x_f32, axis=axis, keepdims=True)
    return jnp.sum(x_f32 ** power, axis=axis, keepdims=True)


def _root(s, power):
    return jnp.sqrt(s) if power == 2 else jnp.power(s, 1.0 / power)


def _rows_kernel(x_ref, o_ref, *, power):
    """2-D path: block (TM, C); normalize each row over the lane axis."""
    x = x_ref[...].astype(jnp.float32)                    # (TM, C)
    norm = _root(_pow_sum(x, -1, power), power)           # (TM, 1)
    inv = 1.0 / (norm + 1e-7)                             # skinny: cheap
    o_ref[...] = (x * inv).astype(o_ref.dtype)


def _rows_packed_kernel(x_ref, o_ref, *, power, group, feat):
    """2-D narrow-C path: block (TM, group*feat) with `group` logical rows
    packed along 128 lanes; segmented reduce/broadcast via the idle MXU so
    loads and stores stay fully lane-dense (no masked vst)."""
    width = group * feat
    x = x_ref[...].astype(jnp.float32)                    # (TM, width)

    lane = jax.lax.broadcasted_iota(jnp.int32, (width, group), 0)
    grp = jax.lax.broadcasted_iota(jnp.int32, (width, group), 1)
    seg = (lane // feat == grp).astype(jnp.float32)       # (width, G)
    lane_t = jax.lax.broadcasted_iota(jnp.int32, (group, width), 1)
    grp_t = jax.lax.broadcasted_iota(jnp.int32, (group, width), 0)
    seg_t = (lane_t // feat == grp_t).astype(jnp.float32)  # (G, width)

    xp = x * x if power == 2 else x ** power
    s = jnp.dot(xp, seg, preferred_element_type=jnp.float32)        # (TM, G)
    inv = 1.0 / (_root(s, power) + 1e-7)                            # (TM, G)
    inv_full = jnp.dot(inv, seg_t, preferred_element_type=jnp.float32)
    o_ref[...] = (x * inv_full).astype(o_ref.dtype)


def _channels_kernel(x_ref, o_ref, *, power):
    """>=3-D path: block (TB, C, TL); normalize over the channel (sublane) axis."""
    x = x_ref[...].astype(jnp.float32)                    # (TB, C, TL)
    norm = _root(_pow_sum(x, 1, power), power)            # (TB, 1, TL)
    inv = 1.0 / (norm + 1e-7)
    o_ref[...] = (x * inv).astype(o_ref.dtype)


# ---------------------------------------------------------------------------
# Tile pickers (byte-budgeted, ragged-grid friendly)
# ---------------------------------------------------------------------------

def _pick_row_tile(n_rows, row_f32_bytes):
    if n_rows <= 8:
        return n_rows                                     # full extent: legal
    budget = _block_f32_budget()
    # TODO(synk): if even an 8-row block exceeds the budget (extremely wide C),
    # switch to a two-pass in-kernel chunked reduction instead of best-effort.
    tm = max(8, (budget // max(row_f32_bytes, 1)) // 8 * 8)
    tm = min(tm, (n_rows // 8) * 8)
    # Keep >=2 grid steps so both v7x TensorCores (megacore) get work.
    if tm >= n_rows:
        tm = max(8, _round_up(_cdiv(n_rows, 2), 8))
    return tm


def _pick_chan_tiles(b, c, l):
    budget = _block_f32_budget()
    if l < 128:
        tl = l                                            # full extent: legal
    else:
        tl = max(128, (budget // max(c * 4, 1)) // 128 * 128)
        tl = min(tl, (l // 128) * 128)
    tb = max(1, budget // max(c * tl * 4, 1))
    tb = min(tb, b)
    # Keep >=2 total grid steps where possible (v7x has 2 TensorCores).
    if _cdiv(b, tb) * _cdiv(l, tl) <= 1:
        if b > 1:
            tb = _cdiv(b, 2)
        elif l > 128:
            tl = max(128, _round_up(_cdiv(l, 2), 128))
    return tb, tl


# ---------------------------------------------------------------------------
# Wrappers
# ---------------------------------------------------------------------------

def _normalize_2d(x, power):
    n, c = x.shape
    # Lane-dense packing for narrow feature dims.
    if 0 < c < 128 and 128 % c == 0:
        g = 128 // c
        if n % g == 0:
            return _normalize_2d_packed(x, power, g)
    tm = _pick_row_tile(n, c * 4)
    kernel = functools.partial(_rows_kernel, power=power)
    return pl.pallas_call(
        kernel,
        out_shape=jax.ShapeDtypeStruct((n, c), x.dtype),
        grid_spec=pltpu.PrefetchScalarGridSpec(
            num_scalar_prefetch=0,
            grid=(_cdiv(n, tm),),
            in_specs=[pl.BlockSpec((tm, c), lambda i: (i, 0))],
            out_specs=pl.BlockSpec((tm, c), lambda i: (i, 0)),
        ),
        compiler_params=pltpu.CompilerParams(
            dimension_semantics=("parallel",),
            vmem_limit_bytes=_vmem_limit_bytes()),
    )(x)


def _normalize_2d_packed(x, power, g):
    n, c = x.shape
    rows = n // g
    width = g * c                                         # == 128
    x_packed = x.reshape(rows, width)                     # row-major: no copy
    tm = _pick_row_tile(rows, width * 4)
    kernel = functools.partial(_rows_packed_kernel, power=power, group=g, feat=c)
    out = pl.pallas_call(
        kernel,
        out_shape=jax.ShapeDtypeStruct((rows, width), x.dtype),
        grid_spec=pltpu.PrefetchScalarGridSpec(
            num_scalar_prefetch=0,
            grid=(_cdiv(rows, tm),),
            in_specs=[pl.BlockSpec((tm, width), lambda i: (i, 0))],
            out_specs=pl.BlockSpec((tm, width), lambda i: (i, 0)),
        ),
        compiler_params=pltpu.CompilerParams(
            dimension_semantics=("parallel",),
            vmem_limit_bytes=_vmem_limit_bytes()),
    )(x_packed)
    return out.reshape(n, c)


def _normalize_3d(x3, power):
    b, c, l = x3.shape
    tb, tl = _pick_chan_tiles(b, c, l)
    kernel = functools.partial(_channels_kernel, power=power)
    return pl.pallas_call(
        kernel,
        out_shape=jax.ShapeDtypeStruct((b, c, l), x3.dtype),
        grid_spec=pltpu.PrefetchScalarGridSpec(
            num_scalar_prefetch=0,
            grid=(_cdiv(b, tb), _cdiv(l, tl)),
            in_specs=[pl.BlockSpec((tb, c, tl), lambda i, j: (i, 0, j))],
            out_specs=pl.BlockSpec((tb, c, tl), lambda i, j: (i, 0, j)),
        ),
        compiler_params=pltpu.CompilerParams(
            dimension_semantics=("parallel", "parallel"),
            vmem_limit_bytes=_vmem_limit_bytes()),
    )(x3)


def normalize(x, power=2):
    """Equivalent of Normalize(power)(x): Lp-normalize along dim 1."""
    if x.ndim < 2:
        raise ValueError("Normalize expects at least 2 dims (norm over dim 1).")
    if x.ndim == 2:
        return _normalize_2d(x, power)
    b, c = x.shape[0], x.shape[1]
    l = math.prod(x.shape[2:])
    out3 = _normalize_3d(x.reshape(b, c, l), power)
    return out3.reshape(x.shape)


# ---------------------------------------------------------------------------
# Pure-JAX reference (mirrors the PyTorch forward) and self-test
# ---------------------------------------------------------------------------

def _reference(x, power=2):
    norm = jnp.power(jnp.sum(jnp.power(x, power), axis=1, keepdims=True),
                     1.0 / power)
    return x / (norm + 1e-7)


if __name__ == "__main__":
    key = jax.random.PRNGKey(0)
    k1, k2 = jax.random.split(key)

    # 4-D conv-feature case: (batch=2, channels=4, spatial=16x16).
    x4 = jax.random.normal(k1, (2, 4, 16, 16), dtype=jnp.float32)
    # 2-D patch-feature case: (num_patches=64, hidden=32) -> packed lane path.
    x2 = jax.random.normal(k2, (64, 32), dtype=jnp.float32)

    out4 = normalize(x4, power=2)
    out2 = normalize(x2, power=2)
    jax.block_until_ready((out4, out2))

    ref4 = _reference(x4, 2)
    ref2 = _reference(x2, 2)

    assert out4.shape == x4.shape and out4.dtype == x4.dtype
    assert out2.shape == x2.shape and out2.dtype == x2.dtype
    assert jnp.allclose(out4, ref4, atol=1e-5, rtol=1e-5)
    assert jnp.allclose(out2, ref2, atol=1e-5, rtol=1e-5)

    print("KERNEL_OK")
</pallas_src>

<mosaic_0001>
module attributes {stable_mosaic.version = 11 : i64} {
  func.func @_channels_kernel(%arg0: i32, %arg1: i32, %arg2: memref<1x4x256xf32, #tpu.memory_space<vmem>>, %arg3: memref<1x4x256xf32, #tpu.memory_space<vmem>>) attributes {dimension_semantics = [#tpu.dimension_semantics<parallel>, #tpu.dimension_semantics<parallel>], iteration_bounds = array<i64: 2, 1>, scalar_prefetch = 0 : i64, scratch_operands = 0 : i64, tpu.core_type = #tpu.core_type<tc>, window_params = [{transform_indices = @transform_0, window_bounds = array<i64: 1, 4, 256>}, {transform_indices = @transform_1, window_bounds = array<i64: 1, 4, 256>}]} {
    %c0 = arith.constant 0 : index
    %c0_0 = arith.constant 0 : index
    %c0_1 = arith.constant 0 : index
    %0 = vector.load %arg2[%c0, %c0_0, %c0_1] : memref<1x4x256xf32, #tpu.memory_space<vmem>>, vector<1x4x256xf32>
    %1 = arith.mulf %0, %0 : vector<1x4x256xf32>
    %cst = arith.constant dense<0.000000e+00> : vector<1x256xf32>
    %2 = vector.multi_reduction <add>, %1, %cst [1] : vector<1x4x256xf32> to vector<1x256xf32>
    %3 = vector.shape_cast %2 : vector<1x256xf32> to vector<1x1x256xf32>
    %4 = math.sqrt %3 : vector<1x1x256xf32>
    %cst_2 = arith.constant 1.000000e-07 : f32
    %5 = vector.broadcast %cst_2 : f32 to vector<1x1x256xf32>
    %6 = arith.addf %4, %5 : vector<1x1x256xf32>
    %cst_3 = arith.constant 1.000000e+00 : f32
    %7 = vector.broadcast %cst_3 : f32 to vector<1x1x256xf32>
    %8 = arith.divf %7, %6 : vector<1x1x256xf32>
    %9 = vector.broadcast %8 : vector<1x1x256xf32> to vector<1x4x256xf32>
    %10 = arith.mulf %0, %9 : vector<1x4x256xf32>
    %c0_4 = arith.constant 0 : index
    %c0_5 = arith.constant 0 : index
    %c0_6 = arith.constant 0 : index
    %11 = vector.load %arg3[%c0_4, %c0_5, %c0_6] : memref<1x4x256xf32, #tpu.memory_space<vmem>>, vector<1x4x256xf32>
    tpu.vector_store %arg3[%c0_4, %c0_5, %c0_6], %10 {strides = array<i32>} : memref<1x4x256xf32, #tpu.memory_space<vmem>>, vector<1x4x256xf32>,
    return
  }
  func.func @transform_0(%arg0: i32, %arg1: i32) -> (i32, i32, i32) {
    %c0_i32 = arith.constant 0 : i32
    %c0_i32_0 = arith.constant 0 : i32
    return %arg0, %c0_i32, %arg1 : i32, i32, i32
  }
  func.func @transform_1(%arg0: i32, %arg1: i32) -> (i32, i32, i32) {
    %c0_i32 = arith.constant 0 : i32
    %c0_i32_0 = arith.constant 0 : i32
    return %arg0, %c0_i32, %arg1 : i32, i32, i32
  }
}

</mosaic_0001>

<bundles_post_ra>
// kernel: tpu_custom_call.1
= control target key start
LH: loop header
LB: loop body
LE: loop exit
PB: predicated region body
PF: predicated region fallthrough
CT: control target
= control target key end

     0   :  { %6 = vsyncpa [#allocation3], 0  ;;  %s689_s0 = inlined_call_operand.hbm [shape: f32[2,4,256], index: 0, kind: input, shape index: {}]   ;;  %s690_s1 = inlined_call_operand.hbm [shape: f32[2,4,256], index: 1, kind: output, shape index: {}]  }
   0x1   :  { %8 = vsyncpa [#allocation3 + $0x1], 0 }
   0x2   :  { %9 = vsyncpa [#allocation4], 0 }
   0x3   :  { %11 = vsyncpa [#allocation4 + $0x1], 0  ;;  %s513_s6 = smov 0   ;;  %s515_s7 = smov 0  }
   0x4   :  { %s517_s8 = smov 0   ;;  %s519_s9 = smov 0  }
   0x5   :  { %s521_s10 = smov 0   ;;  %s523_s11 = smov 0  }
   0x6 LB: > { %s300_s12 = sadd.s32 4294967295, %s499_s11   ;;  %s301_s13 = sadd.s32 4294967294, %s499_s11   ;;  %s499_s11 = sphi %s523_s11, %s17_s11   ;;  %s495_s10 = sphi %s521_s10, %s706_s10   ;;  %s491_s9 = sphi %s519_s9, %s705_s9   ;;  %s487_s8 = sphi %s517_s8, %s704_s8   ;;  %s483_s7 = sphi %s515_s7, %s703_s7   ;;  %s479_s6 = sphi %s513_s6, %s702_s6  }
   0x7   : > { %s29_s14 = sadd.s32 1, %s495_s10  ;;  %s38_s15 = sadd.s32 1, %s487_s8 }
   0x8   : > { %p31_p0 = scmp.ge.s32.totalorder %s29_s14, 2  ;;  %p45_p1 = scmp.ne.s32.totalorder %s487_s8, %s483_s7 }
   0x9   : > { %p46_p2 = scmp.eq.s32.totalorder %s499_s11, 0  ;;  %p51_p3 = scmp.ne.s32.totalorder %s483_s7, %s479_s6 }
   0xa   : > { %s708_s14 = smov (%p31_p0, %s29_s14), 0  ;;  %p52_p5 = scmp.eq.s32.totalorder %s300_s12, 0 }
   0xb   : > { %p554_p4 = por %p46_p2, %p45_p1  ;;  %s33_s17 = ssub.s32 %s495_s10, %s708_s14 }
   0xc   : > { %p77_p6 = scmp.eq.s32.totalorder %s300_s12, 1  ;;  %p36_p7 = scmp.eq.s32.totalorder %s33_s17, 0 }
   0xd   : > { %p560_p8 = por %p52_p5, %p51_p3  ;;  %p83_p10 = scmp.eq.s32.totalorder %s301_s13, 1 }
   0xe   : > { %p564_p9 = por %p77_p6, %p45_p1  ;;  %p329_p13 = scmp.lt.s32.totalorder %s499_s11, 2 }
   0xf   : > { %s569_s20 = scalar_select %p36_p7, %s487_s8, %s38_s15  }
  0x10   : > { %s694_s19 = scalar_select %p564_p9, 1, 0 }
  0x11   : > { %p571_p11 = por %p83_p10, %p51_p3  ;;  %s103_s22 = sand.u32 1, %s487_s8  }
  0x12   : > { %s304_s23 = sshll.u32 %s103_s22, 3  ;;  %s315_s24 = sshll.u32 %s495_s10, 7 }
  0x13   : > { %s695_s21 = scalar_select %p571_p11, 1, 0 }
  0x14   : > { %s582_s27 = scalar_lea.hbm %s689_s0, %s315_s24  ;;  %s107_s28 = scalar_lea.vmem [#allocation2], %s304_s23 }
  0x15   : > { %s117_s29 = sshll.u32 %s107_s28, 4  ;;  %p588_p0 = pnand %p329_p13, %p554_p4  ;;  %s584_s29 = int_to_ptr.vmem [resolvable:$true] %s117_s29 }
  0x16   : > { %s104_s2 = scalar_lea.sflag [#allocation3], %s103_s22  ;;  %s387_s3 = scalar_lea.hbm %s582_s27, 128 }
  0x17   : > { %p388_p3 = scmp.ne.s32.totalorder %s582_s27, %s387_s3  ;;  %p389_p5 = pneg %p588_p0 }
  0x18   : > { %s392_s12 = scalar_lea.hbm %s689_s0, 256  ;;  %p393_p4 = scmp.lt.u32.totalorder %s582_s27, %s689_s0 }
  0x19   : > { %p390_p6 = pnand %p389_p5, %p388_p3  ;;  %p394_p10 = scmp.lt.u32.totalorder %s392_s12, %s387_s3 }
  0x1a   : > { %p396_p12 = scmp.lt.u32.totalorder %s387_s3, %s582_s27 }
  0x1b   : > { %p391_p7 = pneg %p390_p6  ;;  %p395_p13 = por %p394_p10, %p393_p4 }
  0x1d   : > { %p397_p1 = por %p396_p12, %p395_p13 }
  0x1f   : > { %p398_p2 = pnand %p397_p1, %p391_p7 }
  0x21   : > { %401 = shalt.err (!%p398_p2)
}
  0x22   : > { %s402_s16 = scalar_lea.vmem %s584_s29, 128  ;;  %s501_s17 = smov [#allocation2]  }
  0x23   : > { %p403_p3 = scmp.ne.s32.totalorder %s584_s29, %s402_s16  ;;  %s407_s22 = sshll.u32 %s501_s17, 4  ;;  %s408_s22 = int_to_ptr.vmem [resolvable:$false] %s407_s22 }
  0x24   : > { %s409_s23 = scalar_lea.vmem %s408_s22, 256  ;;  %p410_p9 = scmp.lt.s32.totalorder %s584_s29, %s408_s22 }
  0x25   : > { %p405_p6 = pnand %p403_p3, %p389_p5  ;;  %p411_p4 = scmp.lt.s32.totalorder %s409_s23, %s402_s16 }
  0x27   : > { %p406_p11 = pneg %p405_p6  ;;  %p412_p10 = por %p411_p4, %p410_p9 }
  0x29   : > { %p413_p12 = pnand %p412_p10, %p406_p11 }
  0x2b   : > { %416 = shalt.err (!%p413_p12)
}
  0x2c   : > { %324 = dma.hbm_to_vmem [thread:$0]  (!%p588_p0), %s582_s27, 128, %s584_s29, %s104_s2  }
  0x2d   : > { %p697_p1 = scmp.lt.s32.totalorder %s499_s11, 3  ;;  %p698_p2 = scmp.ge.s32.totalorder %s499_s11, 1 }
  0x2f   : > { %p123_p5 = pnand %p698_p2, %p697_p1 }
  0x30   : > { %s624_s24 = sand.u32 (!%p123_p5), 1, %s483_s7  }
  0x31   : > { %126 = sbr.rel (%p123_p5) target bundleno = 121 (0x79), region = 24  ;;  %s308_s25 = sshll.u32 (!%p123_p5), %s624_s24, 3 }
  0x32   : > { %s129_s26 = scalar_lea.sflag (!%p123_p5), [#allocation3], %s624_s24  ;;  %s132_s28 = scalar_lea.vmem (!%p123_p5), [#allocation2], %s308_s25 }
  0x38   : > { %470 = dma.done.wait (%p560_p8), %s129_s26, 128  }
  0x39   : > { %472 = vsyncadd (%p560_p8), %s129_s26, 4294967168  ;;  %v153_v0 = vld [vmem:[%s132_s28] sm:$0xff]  ;;  %vm158_vm0 = vcmask 1043456   ;;  %s150_s18 = scalar_lea.vmem [#allocation5], %s308_s25  ;;  %s316_s29 = sshll.u32 %s491_s9, 7 }
  0x3a   : > { %v154_v1 = vmul.f32 %v153_v0, %v153_v0  ;;  %s216_s27 = sshll.u32 %s150_s18, 4  ;;  %s642_s3 = scalar_lea.hbm %s690_s1, %s316_s29  ;;  %s637_s27 = int_to_ptr.vmem [resolvable:$true] %s216_s27 }
  0x3b   : > { %s200_s4 = scalar_lea.sflag [#allocation4], %s624_s24  ;;  %s417_s5 = scalar_lea.vmem %s637_s27, 128 }
  0x3c   : > { %v156_v2 = vcombine.high %v154_v1, %v154_v1  ;;  %v159_v3 = vsel %vm158_vm0, %v154_v1, 0.0  ;;  %p418_p8 = scmp.ne.s32.totalorder %s637_s27, %s417_s5  ;;  %p699_p9 = scmp.ne.s32.totalorder %s694_s19, 0 }
  0x3d   : > { %v160_v4 = vrot.slane %v159_v3, 4  ;;  %s502_s9 = smov [#allocation5]  }
  0x3e   : > { %v166_v5 = vsel %vm158_vm0, %v156_v2, 0.0  ;;  %p419_p11 = pnand %p418_p8, %p699_p9  ;;  %s421_s12 = sshll.u32 %s502_s9, 4  ;;  %s422_s12 = int_to_ptr.vmem [resolvable:$false] %s421_s12 }
  0x3f   : > { %v161_v6 = vadd.f32 %v160_v4, %v159_v3  ;;  %v167_v7 = vrot.slane %v166_v5, 4  ;;  %s423_s13 = scalar_lea.vmem %s422_s12, 256  ;;  %p424_p7 = scmp.lt.s32.totalorder %s637_s27, %s422_s12 }
  0x40   : > { %p420_p0 = pneg %p419_p11  ;;  %p425_p13 = scmp.lt.s32.totalorder %s423_s13, %s417_s5 }
  0x41   : > { %v162_v8 = vrot.slane %v161_v6, 2  ;;  %v168_v9 = vadd.f32 %v167_v7, %v166_v5 }
  0x42   : > { %p426_p3 = por %p425_p13, %p424_p7 }
  0x43   : > { %v163_v10 = vadd.f32 %v162_v8, %v161_v6  ;;  %v169_v11 = vrot.slane %v168_v9, 2 }
  0x44   : > { %p427_p6 = pnand %p426_p3, %p420_p0 }
  0x45   : > { %v164_v12 = vrot.slane %v163_v10, 1  ;;  %v170_v13 = vadd.f32 %v169_v11, %v168_v9 }
  0x47   : > { %v165_v14 = vadd.f32 %v164_v12, %v163_v10  ;;  %v171_v15 = vrot.slane %v170_v13, 1 }
  0x49   : > { %v172_v16 = vadd.f32 %v171_v15, %v170_v13  ;;  %379 = vrsqrt.f32 %v165_v14  ;;  %vm175_vm1 = vcmp.eq.f32.partialorder %v165_v14, inf  ;;  %v178_v18 = vand.u32 2147483648, %v165_v14 }
  0x4a   : > { %vm177_vm2 = vcmp.eq.f32.partialorder %v165_v14, 0.0 }
  0x4b   : > { %381 = vrsqrt.f32 %v172_v16  ;;  %vm182_vm3 = vcmp.eq.f32.partialorder %v172_v16, inf  ;;  %v185_v21 = vand.u32 2147483648, %v172_v16  ;;  %vm184_vm4 = vcmp.eq.f32.partialorder %v172_v16, 0.0 }
  0x53   : > { %v380_v17 = vpop.eup %379 }
  0x54   : > { %v174_v19 = vmul.f32 %v380_v17, %v165_v14 }
  0x55   : > { %v382_v20 = vpop.eup %381 }
  0x56   : > { %v176_v22 = vsel %vm175_vm1, %v165_v14, %v174_v19  ;;  %v181_v23 = vmul.f32 %v382_v20, %v172_v16 }
  0x57   : > { %v179_v24 = vsel %vm177_vm2, %v178_v18, %v176_v22 }
  0x58   : > { %v183_v25 = vsel %vm182_vm3, %v172_v16, %v181_v23  ;;  %v187_v26 = vadd.f32 1e-07, %v179_v24 }
  0x59   : > { %v186_v27 = vsel %vm184_vm4, %v185_v21, %v183_v25 }
  0x5a   : > { %v188_v28 = vadd.f32 1e-07, %v186_v27  ;;  %383 = vrcp.f32 %v187_v26 }
  0x5c   : > { %385 = vrcp.f32 %v188_v28 }
  0x64   : > { %v384_v29 = vpop.eup %383 }
  0x66   : > { %v386_v30 = vpop.eup %385 }
  0x67   : > { %v195_v31 = vcombine.low %v384_v29, %v386_v30 }
  0x69   : > { %v197_v32 = vmul.f32 %v195_v31, %v153_v0 }
  0x6b   : > { %198 = vst [vmem:[%s150_s18] sm:$0xff] %v197_v32 }
  0x6c   : > { %430 = shalt.err (!%p427_p6)
}
  0x6d   : > { %s431_s15 = scalar_lea.hbm %s642_s3, 128  ;;  %s435_s22 = scalar_lea.hbm %s690_s1, 256 }
  0x6e   : > { %p432_p4 = scmp.ne.s32.totalorder %s642_s3, %s431_s15  ;;  %p436_p1 = scmp.lt.u32.totalorder %s642_s3, %s690_s1 }
  0x6f   : > { %p437_p2 = scmp.lt.u32.totalorder %s435_s22, %s431_s15  ;;  %p439_p8 = scmp.lt.u32.totalorder %s431_s15, %s642_s3 }
  0x70   : > { %p433_p10 = pnand %p432_p4, %p699_p9 }
  0x71   : > { %p438_p5 = por %p437_p2, %p436_p1 }
  0x72   : > { %p434_p12 = pneg %p433_p10 }
  0x73   : > { %p440_p11 = por %p439_p8, %p438_p5 }
  0x75   : > { %p441_p0 = pnand %p440_p11, %p434_p12 }
  0x77   : > { %444 = shalt.err (!%p441_p0)
}
  0x78   : > { %319 = dma.vmem_to_hbm [thread:$0]  (%p699_p9), %s637_s27, 128, %s642_s3, %s200_s4  }
  0x79 PF: > { %s228_s25 = sand.u32 1, %s479_s6   ;;  %p700_p7 = scmp.ne.s32.totalorder %s695_s21, 0 }
  0x7a   : > { %p701_p13 = scmp.ge.s32.totalorder %s499_s11, 2  ;;  %s229_s26 = scalar_lea.sflag [#allocation4], %s228_s25 }
  0x7c   : > { %p326_p3 = pnand %p701_p13, %p700_p7 }
  0x7e   : > { %474 = dma.done.wait (!%p326_p3), %s229_s26, 128  }
  0x7f   : > { %476 = vsyncadd (!%p326_p3), %s229_s26, 4294967168  ;;  %s17_s11 = sadd.s32 1, %s499_s11   ;;  %s702_s6 = smov %s483_s7 }
  0x80   : > { %p14_p6 = scmp.ge.s32.totalorder %s17_s11, 4   ;;  %s703_s7 = smov %s487_s8 }
  0x81   : > { %s704_s8 = smov %s569_s20  ;;  %s705_s9 = smov %s495_s10 }
  0x82   : > { %s706_s10 = smov %s708_s14  ;;  %16 = sbr.rel (!%p14_p6) target bundleno = 6 (0x6), region = 69 }
  0x89   :  { %234 = vsyncpa [#allocation3], 1 }
  0x8a   :  { %236 = vsyncpa [#allocation3 + $0x1], 1 }
  0x8b   :  { %237 = vsyncpa [#allocation4], 1 }
  0x8c   :  { %239 = vsyncpa [#allocation4 + $0x1], 1 }

</bundles_post_ra>
